<compile_context>
chip_gen: v6e
topology: v6e:2x2x1
jax: 0.10.0
libtpu: 0.0.40
codegen_flags: <defaults>
</compile_context>

<pallas_src>
import jax
import jax.numpy as jnp
from jax.experimental import pallas as pl
from jax.experimental.pallas import tpu as pltpu


def _drop_path_kernel(x_ref, scale_ref, o_ref):
    # scale_ref: (TILE_N, 1) block already in x.dtype, values in
    # {0, 1/keep_prob}; broadcast over the lane-dense feature tile.
    # Elementwise only -> VPU/DMA, no MXU, no in-kernel cast.
    o_ref[...] = x_ref[...] * scale_ref[...]


def drop_path(x, *, drop_prob, rng_key, training=True,
              max_block_bytes=4 << 20, donate_x=False):
    """Pallas implementation of DropPath.forward for NCHW input.

    max_block_bytes: per-input-block byte budget.  The default (4 MiB) keeps
    the double-buffered pipeline footprint at ~16 MiB, the v7x (64 MiB VMEM)
    sweet spot; do not raise it much on v7x.
    """
    if drop_prob == 0.0 or not training:
        return x
    keep_prob = 1.0 - drop_prob
    n, c, h, w = x.shape
    feat = c * h * w
    x2 = x.reshape(n, feat)

    # Per-sample keep/drop decision in float32 (boundary-stable floor), then
    # the combined scale {0, 1/keep_prob} is cast to x.dtype once here so the
    # kernel body has no cast.  (For bf16 inputs 1/keep_prob is rounded to
    # bf16, matching the PyTorch module which works in x.dtype.)
    rand = jax.random.uniform(rng_key, (n, 1), dtype=jnp.float32)
    scale = (jnp.floor(keep_prob + rand) * (1.0 / keep_prob)).astype(x.dtype)

    itemsize = jnp.dtype(x.dtype).itemsize

    # N tile: full batch if small, else 256 rows (a multiple of the sublane
    # pack granule for f32 / bf16 / int8).  Ragged last block -> cdiv grid.
    tile_n = n if n <= 256 else 256

    # Feature tile: lane-dense (multiple of 128) block bounded by the byte
    # budget; full-dim block only when the whole feature axis already fits.
    max_f = max(128, (max_block_bytes // (tile_n * itemsize)) // 128 * 128)
    tile_f = feat if feat <= max_f else max_f

    grid = (pl.cdiv(n, tile_n), pl.cdiv(feat, tile_f))

    # Feature axis is innermost, so the (tile_n, 1) scale block index is
    # constant across inner steps and is not re-fetched.
    out2 = pl.pallas_call(
        _drop_path_kernel,
        out_shape=jax.ShapeDtypeStruct((n, feat), x.dtype),
        grid=grid,
        in_specs=[
            pl.BlockSpec((tile_n, tile_f), lambda i, j: (i, j)),
            pl.BlockSpec((tile_n, 1), lambda i, j: (i, 0)),
        ],
        out_specs=pl.BlockSpec((tile_n, tile_f), lambda i, j: (i, j)),
        compiler_params=pltpu.CompilerParams(
            dimension_semantics=("parallel", "parallel"),
            vmem_limit_bytes=32 * 1024 * 1024,
        ),
        input_output_aliases=({0: 0} if donate_x else {}),
    )(x2, scale)
    return out2.reshape(n, c, h, w)


def _reference(x, drop_prob, rng_key):
    keep_prob = 1.0 - drop_prob
    n = x.shape[0]
    rand = jax.random.uniform(rng_key, (n, 1), dtype=jnp.float32)
    mask = jnp.floor(keep_prob + rand).reshape(n, 1, 1, 1).astype(x.dtype)
    return x / keep_prob * mask


if __name__ == "__main__":
    key = jax.random.PRNGKey(0)
    k_x, k_mask, k_x2 = jax.random.split(key, 3)
    drop_prob = 0.25

    # Small NCHW input consistent with the module's forward.
    x = jax.random.normal(k_x, (2, 4, 16, 16), dtype=jnp.float32)
    expected = _reference(x, drop_prob, k_mask)

    # Default tiling (single lane-dense block at this small shape).
    out = drop_path(x, drop_prob=drop_prob, rng_key=k_mask, training=True)
    out = jax.block_until_ready(out)
    assert jnp.allclose(out, expected, atol=1e-6, rtol=1e-5), "default tiling mismatch"

    # Force a multi-tile feature grid (tiny per-block budget) to exercise the
    # pipelined / tiled path and its index maps.
    out_tiled = drop_path(x, drop_prob=drop_prob, rng_key=k_mask, training=True,
                          max_block_bytes=2048)
    out_tiled = jax.block_until_ready(out_tiled)
    assert jnp.allclose(out_tiled, expected, atol=1e-6, rtol=1e-5), "tiled grid mismatch"

    # Ragged feature axis (C*H*W = 400, not a multiple of 128) with a small
    # block budget -> cdiv grid with a masked edge block.
    x_r = jax.random.normal(k_x2, (2, 4, 10, 10), dtype=jnp.float32)
    expected_r = _reference(x_r, drop_prob, k_mask)
    out_r = drop_path(x_r, drop_prob=drop_prob, rng_key=k_mask, training=True,
                      max_block_bytes=1024)
    out_r = jax.block_until_ready(out_r)
    assert jnp.allclose(out_r, expected_r, atol=1e-6, rtol=1e-5), "ragged grid mismatch"

    # Eval mode and drop_prob == 0 are identity passes.
    out_eval = drop_path(x, drop_prob=drop_prob, rng_key=k_mask, training=False)
    assert jnp.allclose(out_eval, x)
    out_zero = drop_path(x, drop_prob=0.0, rng_key=k_mask, training=True)
    assert jnp.allclose(out_zero, x)

    print("KERNEL_OK")
</pallas_src>

<mosaic_0001>
module attributes {stable_mosaic.version = 11 : i64} {
  func.func @_drop_path_kernel(%arg0: i32, %arg1: i32, %arg2: memref<2x1024xf32, #tpu.memory_space<vmem>>, %arg3: memref<2x1xf32, #tpu.memory_space<vmem>>, %arg4: memref<2x1024xf32, #tpu.memory_space<vmem>>) attributes {dimension_semantics = [#tpu.dimension_semantics<parallel>, #tpu.dimension_semantics<parallel>], iteration_bounds = array<i64: 1, 1>, scalar_prefetch = 0 : i64, scratch_operands = 0 : i64, tpu.core_type = #tpu.core_type<tc>, window_params = [{transform_indices = @transform_0, window_bounds = array<i64: 2, 1024>}, {transform_indices = @transform_1, window_bounds = array<i64: 2, 1>}, {transform_indices = @transform_2, window_bounds = array<i64: 2, 1024>}]} {
    %c0 = arith.constant 0 : index
    %c0_0 = arith.constant 0 : index
    %0 = vector.load %arg2[%c0, %c0_0] : memref<2x1024xf32, #tpu.memory_space<vmem>>, vector<2x1024xf32>
    %c0_1 = arith.constant 0 : index
    %c0_2 = arith.constant 0 : index
    %1 = vector.load %arg3[%c0_1, %c0_2] : memref<2x1xf32, #tpu.memory_space<vmem>>, vector<2x1xf32>
    %2 = vector.broadcast %1 : vector<2x1xf32> to vector<2x1024xf32>
    %3 = arith.mulf %0, %2 : vector<2x1024xf32>
    %c0_3 = arith.constant 0 : index
    %c0_4 = arith.constant 0 : index
    %4 = vector.load %arg4[%c0_3, %c0_4] : memref<2x1024xf32, #tpu.memory_space<vmem>>, vector<2x1024xf32>
    tpu.vector_store %arg4[%c0_3, %c0_4], %3 {strides = array<i32>} : memref<2x1024xf32, #tpu.memory_space<vmem>>, vector<2x1024xf32>,
    return
  }
  func.func @transform_0(%arg0: i32, %arg1: i32) -> (i32, i32) {
    %c0_i32 = arith.constant 0 : i32
    return %arg0, %arg1 : i32, i32
  }
  func.func @transform_1(%arg0: i32, %arg1: i32) -> (i32, i32) {
    %c0_i32 = arith.constant 0 : i32
    %c0_i32_0 = arith.constant 0 : i32
    return %arg0, %c0_i32 : i32, i32
  }
  func.func @transform_2(%arg0: i32, %arg1: i32) -> (i32, i32) {
    %c0_i32 = arith.constant 0 : i32
    return %arg0, %arg1 : i32, i32
  }
}

</mosaic_0001>

<bundles_post_ra>
// kernel: tpu_custom_call.1
= control target key start
LH: loop header
LB: loop body
LE: loop exit
PB: predicated region body
PF: predicated region fallthrough
CT: control target
= control target key end

     0   :  { %7 = vsyncpa [#allocation3], 0  ;;  %s135_s0 = inlined_call_operand.hbm [shape: f32[2,1024], index: 0, kind: input, shape index: {}]   ;;  %s136_s1 = inlined_call_operand.vmem [shape: f32[2,1], index: 1, kind: input, shape index: {}]   ;;  %s137_s2 = inlined_call_operand.hbm [shape: f32[2,1024], index: 2, kind: output, shape index: {}]  }
   0x1   :  { %8 = vsyncpa [#allocation4], 0  ;;  %s107_s9 = smov [#allocation2]  }
   0x2   :  { %s15_s10 = sshll.u32 %s107_s9, 4  ;;  %s16_s10 = int_to_ptr.vmem [resolvable:$true] %s15_s10 }
   0x3   :  { %s71_s11 = scalar_lea.vmem %s16_s10, 256  ;;  %p76_p1 = scmp.lt.s32.totalorder %s16_s10, %s16_s10 }
   0x4   :  { %p72_p0 = scmp.ne.s32.totalorder %s16_s10, %s71_s11  ;;  %p77_p2 = scmp.lt.s32.totalorder %s71_s11, %s71_s11 }
   0x6   :  { %p78_p3 = por %p77_p2, %p76_p1 }
   0x8   :  { %p79_p4 = pnand %p78_p3, %p72_p0 }
   0xa   :  { %82 = shalt.err (!%p79_p4)
}
   0xb   :  { %18 = dma.hbm_to_vmem [thread:$0]  %s135_s0, 256, %s16_s10, [#allocation3]  }
   0xc   :  { %103 = dma.done.wait [#allocation3], 256  }
   0xd   :  { %104 = vsyncadd [#allocation3], 4294967040  ;;  %v108_v0 = vmov 0   ;;  %v26_v1 = vld [vmem:[%s136_s1] sm:$0x3]  ;;  %v34_v4 = vlaneseq  ;;  %v25_v10 = vld [vmem:[#allocation2 + $0x8] sm:$0xff] }
   0xe   :  { %62 = vset.pattern.permute.xlu0 %v108_v0  ;;  %v109_v2 = vmov 269488144   ;;  %v24_v9 = vld [vmem:[#allocation2] sm:$0xff]  ;;  %s110_s16 = smov [#allocation5]  }
   0xf   :  { %29 = vperm.xlu0 %62, %v26_v1   ;;  %v32_v3 = vunpack.c.l.s4 %v109_v2  ;;  %v35_v6 = vshrl.u32 %v34_v4, 7  ;;  %s49_s0 = sshll.u32 %s110_s16, 4  ;;  %s50_s0 = int_to_ptr.vmem [resolvable:$true] %s49_s0 }
  0x10   :  { %s83_s17 = scalar_lea.vmem %s50_s0, 256  ;;  %p88_p6 = scmp.lt.s32.totalorder %s50_s0, %s50_s0 }
  0x11   :  { %v33_v5 = vunpack.c.0.s8 %v32_v3  ;;  %p84_p5 = scmp.ne.s32.totalorder %s50_s0, %s83_s17  ;;  %p89_p7 = scmp.lt.s32.totalorder %s83_s17, %s83_s17 }
  0x13   :  { %v36_v7 = vsub.s32 %v33_v5, %v35_v6  ;;  %p90_p8 = por %p89_p7, %p88_p6 }
  0x15   :  { %p91_p9 = pnand %p90_p8, %p84_p5 }
  0x8a   :  { %v30_v8 = vpop.permute.xlu0 %29 }
  0x8b   :  { %v37_v11 = vrot.slane %v30_v8, %v36_v7 }
  0x8d   :  { %v39_v12 = vmul.f32 %v37_v11, %v24_v9  ;;  %v40_v13 = vmul.f32 %v37_v11, %v25_v10 }
  0x8f   :  { %41 = vst [vmem:[#allocation5] sm:$0xff] %v39_v12  ;;  %42 = vst [vmem:[#allocation5 + $0x8] sm:$0xff] %v40_v13 }
  0x90   :  { %94 = shalt.err (!%p91_p9)
}
  0x91   :  { %52 = dma.vmem_to_hbm [thread:$0]  %s50_s0, 256, %s137_s2, [#allocation4]  }
  0x92   :  { %105 = dma.done.wait [#allocation4], 256  }
  0x93   :  { %106 = vsyncadd [#allocation4], 4294967040 }
  0x94   :  { %56 = vsyncpa [#allocation3], 1 }
  0x95   :  { %57 = vsyncpa [#allocation4], 1 }

</bundles_post_ra>
